<compile_context>
chip_gen: v6e
topology: v6e:2x2x1
jax: 0.10.0
libtpu: 0.0.40
codegen_flags: <defaults>
</compile_context>

<pallas_src>
import numpy as np
import jax
import jax.numpy as jnp
from jax.experimental import pallas as pl
from jax.experimental.pallas import tpu as pltpu


_INV_SQRT2 = 0.7071067811865476  # 1 / sqrt(2)


def _mlp_kernel(x_ref, w1_ref, b1_ref, w2_ref, b2_ref, o_ref):
    """One column (token) tile, transposed layout.

    x_ref : (c_in,  block_cols)  bf16   -- x^T tile
    w1_ref: (hidden, c_in)       bf16   -- fc1 weight (PyTorch layout)
    b1_ref: (hidden, 1)          f32
    w2_ref: (c_out, hidden)      bf16   -- fc2 weight (PyTorch layout)
    b2_ref: (c_out, 1)           f32
    o_ref : (c_out, block_cols)  x.dtype -- out^T tile
    """
    xt = x_ref[...]                                                    # bf16

    # fc1: (hidden, c_in) @ (c_in, cols) -> (hidden, cols), f32 accumulate on MXU
    h = jnp.dot(w1_ref[...], xt, preferred_element_type=jnp.float32)
    h = h + b1_ref[...]                                                # f32 bias

    # exact GELU (matches nn.GELU default); erf runs on the EUP slot, all f32.
    h = 0.5 * h * (1.0 + jax.lax.erf(h * _INV_SQRT2))

    # fc2: (c_out, hidden) @ (hidden, cols) -> (c_out, cols); bf16 MXU operands.
    out = jnp.dot(w2_ref[...], h.astype(jnp.bfloat16),
                  preferred_element_type=jnp.float32)
    out = out + b2_ref[...]

    o_ref[...] = out.astype(o_ref.dtype)


def mlp_forward(x, params, *, block_cols=256):
    """Apply the MLP to x of shape (..., c_in); returns (..., c_out) in x.dtype.

    params:
      w1: (hidden, c_in)  bfloat16   (PyTorch fc1.weight layout)
      b1: (hidden, 1)     float32
      w2: (c_out, hidden) bfloat16   (PyTorch fc2.weight layout)
      b2: (c_out, 1)      float32
    """
    orig_shape = x.shape
    c_in = orig_shape[-1]
    hidden = params["w1"].shape[0]
    c_out = params["w2"].shape[0]
    out_dtype = x.dtype

    # Lane-dense layout: tokens on the last (lane) axis.  Single fused
    # bf16-cast + transpose (half the bytes of an f32 copy); no jnp.pad —
    # the ragged last block is handled by Pallas' boundary masking.
    x_t = x.reshape(-1, c_in).astype(jnp.bfloat16).T            # (c_in, M)
    m = x_t.shape[1]
    grid = (pl.cdiv(m, block_cols),)

    flops = 2 * m * (c_in * hidden + hidden * c_out)
    bytes_accessed = (
        x_t.size * 2                                             # bf16 x^T
        + (params["w1"].size + params["w2"].size) * 2            # bf16 weights
        + (params["b1"].size + params["b2"].size) * 4            # f32 biases
        + m * c_out * jnp.dtype(out_dtype).itemsize              # output
    )

    out_t = pl.pallas_call(
        _mlp_kernel,
        out_shape=jax.ShapeDtypeStruct((c_out, m), out_dtype),
        grid=grid,
        in_specs=[
            pl.BlockSpec((c_in, block_cols), lambda i: (0, i)),   # x^T column tile
            pl.BlockSpec((hidden, c_in),     lambda i: (0, 0)),   # W1 (VMEM-resident)
            pl.BlockSpec((hidden, 1),        lambda i: (0, 0)),   # b1 (resident)
            pl.BlockSpec((c_out, hidden),    lambda i: (0, 0)),   # W2 (resident)
            pl.BlockSpec((c_out, 1),         lambda i: (0, 0)),   # b2 (resident)
        ],
        out_specs=pl.BlockSpec((c_out, block_cols), lambda i: (0, i)),
        compiler_params=pltpu.CompilerParams(
            dimension_semantics=("parallel",),
            vmem_limit_bytes=32 * 1024 * 1024,
        ),
        cost_estimate=pl.CostEstimate(
            flops=flops,
            transcendentals=m * hidden,
            bytes_accessed=bytes_accessed,
        ),
    )(x_t, params["w1"], params["b1"], params["w2"], params["b2"])

    return out_t.T.reshape(*orig_shape[:-1], c_out)


# ----------------------------------------------------------------------------
# Pure-JAX f32 reference (mirrors the PyTorch forward) for a correctness check.
# ----------------------------------------------------------------------------
def _reference(x, params):
    w1 = params["w1"].astype(jnp.float32)
    w2 = params["w2"].astype(jnp.float32)
    h = x @ w1.T + params["b1"][:, 0]
    h = jax.nn.gelu(h, approximate=False)       # nn.GELU default (exact, erf)
    return h @ w2.T + params["b2"][:, 0]        # dropout p=0.0 -> identity


if __name__ == "__main__":
    # Token-MLP shapes typical for this module (mlp_ratio=4): (batch, tokens, C)
    B, N = 2, 1024
    in_features = 32
    hidden_features = 128
    out_features = 32

    key = jax.random.PRNGKey(0)
    ks = jax.random.split(key, 5)
    x = jax.random.normal(ks[0], (B, N, in_features), jnp.float32)

    params = {
        # PyTorch nn.Linear layout: weight (out_features, in_features).
        "w1": (jax.random.normal(ks[1], (hidden_features, in_features), jnp.float32)
               * 0.05).astype(jnp.bfloat16),
        "b1": jax.random.normal(ks[2], (hidden_features, 1), jnp.float32) * 0.01,
        "w2": (jax.random.normal(ks[3], (out_features, hidden_features), jnp.float32)
               * 0.05).astype(jnp.bfloat16),
        "b2": jax.random.normal(ks[4], (out_features, 1), jnp.float32) * 0.01,
    }

    out = mlp_forward(x, params)
    out = jax.block_until_ready(out)

    ref = _reference(x, params)
    # Tolerance loosened vs. pure-f32 reference because matmul operands are bf16.
    np.testing.assert_allclose(np.asarray(out, dtype=np.float32),
                               np.asarray(ref, dtype=np.float32),
                               rtol=3e-2, atol=3e-2)

    print("KERNEL_OK")
</pallas_src>

<mosaic_0001>
module attributes {stable_mosaic.version = 11 : i64} {
  func.func @_mlp_kernel(%arg0: i32, %arg1: memref<32x256xbf16, #tpu.memory_space<vmem>>, %arg2: memref<128x32xbf16, #tpu.memory_space<vmem>>, %arg3: memref<128x1xf32, #tpu.memory_space<vmem>>, %arg4: memref<32x128xbf16, #tpu.memory_space<vmem>>, %arg5: memref<32x1xf32, #tpu.memory_space<vmem>>, %arg6: memref<32x256xf32, #tpu.memory_space<vmem>>) attributes {dimension_semantics = [#tpu.dimension_semantics<parallel>], iteration_bounds = array<i64: 8>, scalar_prefetch = 0 : i64, scratch_operands = 0 : i64, tpu.core_type = #tpu.core_type<tc>, window_params = [{transform_indices = @transform_0, window_bounds = array<i64: 32, 256>}, {pipeline_mode = #tpu.pipeline_mode<synchronous>, transform_indices = @transform_1, window_bounds = array<i64: 128, 32>}, {pipeline_mode = #tpu.pipeline_mode<synchronous>, transform_indices = @transform_2, window_bounds = array<i64: 128, 1>}, {pipeline_mode = #tpu.pipeline_mode<synchronous>, transform_indices = @transform_3, window_bounds = array<i64: 32, 128>}, {pipeline_mode = #tpu.pipeline_mode<synchronous>, transform_indices = @transform_4, window_bounds = array<i64: 32, 1>}, {transform_indices = @transform_5, window_bounds = array<i64: 32, 256>}]} {
    %c0 = arith.constant 0 : index
    %c0_0 = arith.constant 0 : index
    %0 = vector.load %arg1[%c0, %c0_0] : memref<32x256xbf16, #tpu.memory_space<vmem>>, vector<32x256xbf16>
    %c0_1 = arith.constant 0 : index
    %c0_2 = arith.constant 0 : index
    %1 = vector.load %arg2[%c0_1, %c0_2] : memref<128x32xbf16, #tpu.memory_space<vmem>>, vector<128x32xbf16>
    %cst = arith.constant dense<0.000000e+00> : vector<128x256xf32>
    %2 = tpu.matmul %1, %0, %cst {dimension_numbers = #tpu.dot_dimension_numbers<[1], [0], [0], [1], [0, 0, 1, 1], [], []>} : vector<128x32xbf16>, vector<32x256xbf16>, vector<128x256xf32> -> vector<128x256xf32>
    %c0_3 = arith.constant 0 : index
    %c0_4 = arith.constant 0 : index
    %3 = vector.load %arg3[%c0_3, %c0_4] : memref<128x1xf32, #tpu.memory_space<vmem>>, vector<128x1xf32>
    %4 = vector.broadcast %3 : vector<128x1xf32> to vector<128x256xf32>
    %5 = arith.addf %2, %4 : vector<128x256xf32>
    %cst_5 = arith.constant 5.000000e-01 : f32
    %6 = vector.broadcast %cst_5 : f32 to vector<128x256xf32>
    %7 = arith.mulf %6, %5 : vector<128x256xf32>
    %cst_6 = arith.constant 0.707106769 : f32
    %8 = vector.broadcast %cst_6 : f32 to vector<128x256xf32>
    %9 = arith.mulf %5, %8 : vector<128x256xf32>
    %10 = math.erf %9 : vector<128x256xf32>
    %cst_7 = arith.constant 1.000000e+00 : f32
    %11 = vector.broadcast %cst_7 : f32 to vector<128x256xf32>
    %12 = arith.addf %11, %10 : vector<128x256xf32>
    %13 = arith.mulf %7, %12 : vector<128x256xf32>
    %c0_8 = arith.constant 0 : index
    %c0_9 = arith.constant 0 : index
    %14 = vector.load %arg4[%c0_8, %c0_9] : memref<32x128xbf16, #tpu.memory_space<vmem>>, vector<32x128xbf16>
    %15 = arith.truncf %13 : vector<128x256xf32> to vector<128x256xbf16>
    %cst_10 = arith.constant dense<0.000000e+00> : vector<32x256xf32>
    %16 = tpu.matmul %14, %15, %cst_10 {dimension_numbers = #tpu.dot_dimension_numbers<[1], [0], [0], [1], [0, 0, 1, 1], [], []>} : vector<32x128xbf16>, vector<128x256xbf16>, vector<32x256xf32> -> vector<32x256xf32>
    %c0_11 = arith.constant 0 : index
    %c0_12 = arith.constant 0 : index
    %17 = vector.load %arg5[%c0_11, %c0_12] : memref<32x1xf32, #tpu.memory_space<vmem>>, vector<32x1xf32>
    %18 = vector.broadcast %17 : vector<32x1xf32> to vector<32x256xf32>
    %19 = arith.addf %16, %18 : vector<32x256xf32>
    %c0_13 = arith.constant 0 : index
    %c0_14 = arith.constant 0 : index
    %20 = vector.load %arg6[%c0_13, %c0_14] : memref<32x256xf32, #tpu.memory_space<vmem>>, vector<32x256xf32>
    tpu.vector_store %arg6[%c0_13, %c0_14], %19 {strides = array<i32>} : memref<32x256xf32, #tpu.memory_space<vmem>>, vector<32x256xf32>,
    return
  }
  func.func @transform_0(%arg0: i32) -> (i32, i32) {
    %c0_i32 = arith.constant 0 : i32
    %c0_i32_0 = arith.constant 0 : i32
    return %c0_i32, %arg0 : i32, i32
  }
  func.func @transform_1(%arg0: i32) -> (i32, i32) {
    %c0_i32 = arith.constant 0 : i32
    %c0_i32_0 = arith.constant 0 : i32
    %c0_i32_1 = arith.constant 0 : i32
    return %c0_i32, %c0_i32_0 : i32, i32
  }
  func.func @transform_2(%arg0: i32) -> (i32, i32) {
    %c0_i32 = arith.constant 0 : i32
    %c0_i32_0 = arith.constant 0 : i32
    %c0_i32_1 = arith.constant 0 : i32
    return %c0_i32, %c0_i32_0 : i32, i32
  }
  func.func @transform_3(%arg0: i32) -> (i32, i32) {
    %c0_i32 = arith.constant 0 : i32
    %c0_i32_0 = arith.constant 0 : i32
    %c0_i32_1 = arith.constant 0 : i32
    return %c0_i32, %c0_i32_0 : i32, i32
  }
  func.func @transform_4(%arg0: i32) -> (i32, i32) {
    %c0_i32 = arith.constant 0 : i32
    %c0_i32_0 = arith.constant 0 : i32
    %c0_i32_1 = arith.constant 0 : i32
    return %c0_i32, %c0_i32_0 : i32, i32
  }
  func.func @transform_5(%arg0: i32) -> (i32, i32) {
    %c0_i32 = arith.constant 0 : i32
    %c0_i32_0 = arith.constant 0 : i32
    return %c0_i32, %arg0 : i32, i32
  }
}

</mosaic_0001>

<bundles_post_ra>
// kernel: tpu_custom_call.1
= control target key start
LH: loop header
LB: loop body
LE: loop exit
PB: predicated region body
PF: predicated region fallthrough
CT: control target
= control target key end

     0   :  { %10 = vsyncpa [#allocation3], 0  ;;  %s1698_s0 = inlined_call_operand.hbm [shape: bf16[32,2048], index: 0, kind: input, shape index: {}]   ;;  %s1699_s1 = inlined_call_operand.vmem [shape: bf16[128,32], index: 1, kind: input, shape index: {}]   ;;  %s1700_s2 = inlined_call_operand.vmem [shape: f32[128,1], index: 2, kind: input, shape index: {}]   ;;  %s1701_s3 = inlined_call_operand.vmem [shape: bf16[32,128], index: 3, kind: input, shape index: {}]   ;;  %s1702_s4 = inlined_call_operand.vmem [shape: f32[32,1], index: 4, kind: input, shape index: {}]   ;;  %s1703_s5 = inlined_call_operand.hbm [shape: f32[32,2048], index: 5, kind: output, shape index: {}]  }
   0x1   :  { %12 = vsyncpa [#allocation3 + $0x1], 0 }
   0x2   :  { %13 = vsyncpa [#allocation4], 0 }
   0x3   :  { %15 = vsyncpa [#allocation4 + $0x1], 0  ;;  %s1230_s18 = smov 0   ;;  %s1232_s19 = smov 0  }
   0x4   :  { %s1234_s20 = smov 0   ;;  %s1236_s21 = smov 0  }
   0x5 LB: > { %s1251_s22 = sadd.s32 4294967295, %s1189_s21   ;;  %s924_s23 = sadd.s32 4294967294, %s1189_s21   ;;  %s1189_s21 = sphi %s1236_s21, %s1722_s21   ;;  %s1185_s20 = sphi %s1234_s20, %s1721_s20   ;;  %s1181_s19 = sphi %s1232_s19, %s1720_s19   ;;  %s1177_s18 = sphi %s1230_s18, %s1719_s18  }
   0x6   : > { %s1255_s24 = sadd.s32 1, %s1189_s21   ;;  %s28_s25 = sadd.s32 1, %s1185_s20 }
   0x7   : > { %s25_s26 = ssub.s32 %s1189_s21, %s1255_s24  ;;  %p35_p0 = scmp.ne.s32.totalorder %s1185_s20, %s1181_s19 }
   0x8   : > { %p26_p1 = scmp.eq.s32.totalorder %s25_s26, 0  ;;  %p36_p2 = scmp.eq.s32.totalorder %s1189_s21, 0 }
   0x9   : > { %p41_p3 = scmp.ne.s32.totalorder %s1181_s19, %s1177_s18  ;;  %p42_p4 = scmp.eq.s32.totalorder %s1251_s22, 0 }
   0xa   : > { %s1267_s27 = scalar_select %p26_p1, %s1185_s20, %s28_s25  }
   0xb   : > { %p1269_p5 = por %p36_p2, %p35_p0  ;;  %p1273_p6 = por %p42_p4, %p41_p3 }
   0xc   : > { %p149_p7 = scmp.eq.s32.totalorder %s1251_s22, 7  ;;  %p155_p8 = scmp.eq.s32.totalorder %s924_s23, 7 }
   0xd   : > { %s1708_s29 = scalar_select %p1273_p6, 1, 0 }
   0xe   : > { %p974_p9 = scmp.lt.s32.totalorder %s1189_s21, 8  ;;  %p1279_p10 = por %p149_p7, %p35_p0 }
   0xf   : > { %p1283_p11 = por %p155_p8, %p41_p3  ;;  %s187_s7 = sand.u32 1, %s1185_s20  }
  0x10   : > { %s1709_s30 = scalar_select %p1279_p10, 1, 0 }
  0x11   : > { %s1710_s6 = scalar_select %p1283_p11, 1, 0 }
  0x12   : > { %s960_s8 = sshll.u32 %s1189_s21, 7  ;;  %s927_s9 = sshll.u32 %s187_s7, 5 }
  0x13   : > { %s1292_s12 = scalar_lea.hbm %s1698_s0, %s960_s8  ;;  %s191_s13 = scalar_lea.vmem [#allocation2], %s927_s9 }
  0x14   : > { %s198_s14 = sshll.u32 %s191_s13, 4  ;;  %p1296_p12 = pnand %p974_p9, %p1269_p5  ;;  %s1300_s14 = int_to_ptr.vmem [resolvable:$true] %s198_s14 }
  0x15   : > { %s1303_s16 = scalar_lea.sflag [#allocation3], %s187_s7  ;;  %s1097_s17 = scalar_lea.hbm %s1292_s12, 512 }
  0x16   : > { %p1098_p0 = scmp.ne.s32.totalorder %s1292_s12, %s1097_s17  ;;  %p1099_p1 = pneg %p1296_p12 }
  0x17   : > { %s1102_s26 = scalar_lea.hbm %s1698_s0, 4096  ;;  %p1103_p4 = scmp.lt.s32.totalorder %s1292_s12, %s1698_s0 }
  0x18   : > { %p1100_p2 = pnand %p1099_p1, %p1098_p0  ;;  %p1104_p5 = scmp.lt.s32.totalorder %s1102_s26, %s1097_s17 }
  0x1a   : > { %p1101_p3 = pneg %p1100_p2  ;;  %p1105_p7 = por %p1104_p5, %p1103_p4 }
  0x1c   : > { %p1106_p8 = pnand %p1105_p7, %p1101_p3 }
  0x1e   : > { %1109 = shalt.err (!%p1106_p8)
}
  0x1f   : > { %s1110_s7 = scalar_lea.vmem %s1300_s14, 512  ;;  %s1191_s9 = smov [#allocation2]  }
  0x20   : > { %p1111_p9 = scmp.ne.s32.totalorder %s1300_s14, %s1110_s7  ;;  %s1115_s10 = sshll.u32 %s1191_s9, 4  ;;  %s1116_s10 = int_to_ptr.vmem [resolvable:$false] %s1115_s10 }
  0x21   : > { %s1117_s11 = scalar_lea.vmem %s1116_s10, 1024  ;;  %p1118_p2 = scmp.lt.s32.totalorder %s1300_s14, %s1116_s10 }
  0x22   : > { %p1113_p13 = pnand %p1111_p9, %p1099_p1  ;;  %p1119_p11 = scmp.lt.s32.totalorder %s1117_s11, %s1110_s7 }
  0x24   : > { %p1114_p0 = pneg %p1113_p13  ;;  %p1120_p10 = por %p1119_p11, %p1118_p2 }
  0x26   : > { %p1121_p6 = pnand %p1120_p10, %p1114_p0 }
  0x28   : > { %1124 = shalt.err (!%p1121_p6)
}
  0x29   : > { %s1192_s13 = smov 1024   ;;  %s1193_s17 = smov 128  }
  0x2a   : > { %s1194_s23 = smov 8   ;;  %p206_p13 = scmp.lt.s32.totalorder %s1189_s21, 9 }
  0x2b   : > { %969 = dma.hbm_to_vmem [thread:$0]  (!%p1296_p12), %s1292_s12, 512, %s1300_s14, %s1303_s16, %s1192_s13, %s1193_s17, %s1194_s23  }
  0x2c   : > { %p1712_p1 = scmp.ge.s32.totalorder %s1189_s21, 1 }
  0x2e   : > { %p207_p3 = pnand %p1712_p1, %p206_p13 }
  0x2f   : > { %s1328_s25 = sand.u32 (!%p207_p3), 1, %s1181_s19   ;;  %p1713_p6 = scmp.ne.s32.totalorder (!%p207_p3), %s1708_s29, 0 }
  0x30   : > { %210 = sbr.rel (%p207_p3) target bundleno = 600 (0x258), region = 40  ;;  %s931_s26 = sshll.u32 (!%p207_p3), %s1328_s25, 5 }
  0x31   : > { %s213_s28 = scalar_lea.sflag (!%p207_p3), [#allocation3], %s1328_s25  ;;  %s216_s8 = scalar_lea.vmem (!%p207_p3), [#allocation2], %s931_s26 }
  0x35   : > { %1168 = dma.done.wait (%p1713_p6), %s213_s28, 512  }
  0x36   : > { %1170 = vsyncadd (%p1713_p6), %s213_s28, 4294966784  ;;  %v1706_v0 = vmov 0   ;;  %v1017_v1 = vld [vmem:[%s216_s8 + $0x14] ss:$8 sps:$4 sm:$0xff]   ;;  %v1019_v2 = vld [vmem:[%s216_s8 + $0x10] ss:$8 sps:$4 sm:$0xff]  }
  0x37   : > { %479 = vmatprep.mubr.bf16.mxu0 %v1706_v0  ;;  %1015 = vset.pattern.permute.xlu0 %v1706_v0  ;;  %v1020_v3 = vld [vmem:[%s216_s8 + $0x4] ss:$8 sps:$4 sm:$0xff]   ;;  %v1022_v4 = vld [vmem:[%s216_s8] ss:$8 sps:$4 sm:$0xff]   ;;  %vm422_vm0 = vcmask 261120   ;;  %v280_v6 = vld [vmem:[%s1700_s2 + $0x70] sm:$0xff] }
  0x38   : > { %1016 = vset.pattern.permute.xlu1 %v1706_v0  ;;  %808 = vmatprep.mubr.bf16.mxu1 %v1706_v0  ;;  %v1023_v5 = vld [vmem:[%s1699_s1] sm:$0xff]   ;;  %v281_v8 = vld [vmem:[%s1700_s2 + $0x78] sm:$0xff]  ;;  %v279_v9 = vld [vmem:[%s1700_s2 + $0x68] sm:$0xff]  ;;  %s932_s12 = sshll.u32 %s1328_s25, 6  ;;  %s961_s15 = sshll.u32 %s1251_s22, 8 }
  0x39   : > { %459 = vmatprep.subr.bf16.mxu0 %v1017_v1  ;;  %354 = vperm.xlu0 %1015, %v280_v6   ;;  %v278_v7 = vld [vmem:[%s1700_s2 + $0x60] sm:$0xff]  ;;  %v1024_v10 = vld [vmem:[%s1699_s1 + $0x8] sm:$0xff]   ;;  %v276_v11 = vld [vmem:[%s1700_s2 + $0x50] sm:$0xff]  ;;  %s242_s14 = scalar_lea.vmem [#allocation5], %s932_s12  ;;  %s1656_s9 = scalar_lea.hbm %s1703_s5, %s961_s15 }
  0x3a   : > { %460 = vmatpush1.bf16.msra.mxu0 %v1019_v2  ;;  %344 = vperm.xlu1 %1016, %v278_v7   ;;  %v277_v12 = vld [vmem:[%s1700_s2 + $0x58] sm:$0xff]  ;;  %v274_v13 = vld [vmem:[%s1700_s2 + $0x40] sm:$0xff]  ;;  %v275_v14 = vld [vmem:[%s1700_s2 + $0x48] sm:$0xff]  ;;  %s851_s29 = sshll.u32 %s242_s14, 4  ;;  %s838_s10 = scalar_lea.sflag [#allocation4], %s1328_s25  ;;  %s1651_s29 = int_to_ptr.vmem [resolvable:$true] %s851_s29 }
  0x3b   : > { %461 = vmatprep.subr.bf16.mxu0 %v1020_v3  ;;  %v1025_v15 = vld [vmem:[%s1699_s1 + $0x10] sm:$0xff]   ;;  %v273_v17 = vld [vmem:[%s1700_s2 + $0x38] sm:$0xff]  ;;  %v270_v18 = vld [vmem:[%s1700_s2 + $0x20] sm:$0xff]  ;;  %s1125_s22 = scalar_lea.vmem %s1651_s29, 1024  ;;  %p1717_p11 = scmp.ne.s32.totalorder %s1709_s30, 0 }
  0x3c   : > { %v272_v16 = vld [vmem:[%s1700_s2 + $0x30] sm:$0xff]  ;;  %v271_v19 = vld [vmem:[%s1700_s2 + $0x28] sm:$0xff]  ;;  %v1026_v20 = vld [vmem:[%s1699_s1 + $0x18] sm:$0xff]   ;;  %p1126_p10 = scmp.ne.s32.totalorder %s1651_s29, %s1125_s22  ;;  %s1196_s11 = smov [#allocation5]  }
  0x3d   : > { %359 = vperm.xlu0 %1015, %v281_v8   ;;  %v268_v21 = vld [vmem:[%s1700_s2 + $0x10] sm:$0xff]  ;;  %v269_v22 = vld [vmem:[%s1700_s2 + $0x18] sm:$0xff]  ;;  %v266_v23 = vld [vmem:[%s1700_s2] sm:$0xff]  ;;  %s1129_s13 = sshll.u32 %s1196_s11, 4  ;;  %s1130_s13 = int_to_ptr.vmem [resolvable:$false] %s1129_s13 }
  0x3e   : > { %462 = vmatpush1.bf16.msra.mxu0 %v1022_v4  ;;  %349 = vperm.xlu1 %1016, %v279_v9   ;;  %v267_v24 = vld [vmem:[%s1700_s2 + $0x8] sm:$0xff]  ;;  %v1027_v25 = vld [vmem:[%s1699_s1 + $0x20] sm:$0xff]   ;;  %v742_v28 = vld [vmem:[%s1702_s4 + $0x10] sm:$0xff]  ;;  %p1127_p12 = pnand %p1126_p10, %p1717_p11  ;;  %s1131_s17 = scalar_lea.vmem %s1130_s13, 2048 }
  0x3f   : > { %v740_v26 = vld [vmem:[%s1702_s4] sm:$0xff]  ;;  %v741_v27 = vld [vmem:[%s1702_s4 + $0x8] sm:$0xff]  ;;  %v743_v29 = vld [vmem:[%s1702_s4 + $0x18] sm:$0xff]  ;;  %p1132_p5 = scmp.lt.s32.totalorder %s1651_s29, %s1130_s13  ;;  %p1133_p7 = scmp.lt.s32.totalorder %s1131_s17, %s1125_s22 }
  0x40   : > { %v1028_v30 = vld [vmem:[%s1699_s1 + $0x28] sm:$0xff]   ;;  %v1029_v31 = vld [vmem:[%s1699_s1 + $0x30] sm:$0xff]   ;;  %v1030_v32 = vld [vmem:[%s1699_s1 + $0x38] sm:$0xff]   ;;  %p1128_p4 = pneg %p1127_p12 }
  0x41   : > { %945 = vmatmul.mubr.msk.bf16.vlgmr.msra.gmra.mxu0 %vm422_vm0, %v1023_v5  ;;  %334 = vperm.xlu0 %1015, %v276_v11   ;;  %p1134_p8 = por %p1133_p7, %p1132_p5 }
  0x42   : > { %489 = vmatprep.mubr.bf16.mxu0 %v1706_v0  ;;  %339 = vperm.xlu1 %1016, %v277_v12  }
  0x43   : > { %p1135_p9 = pnand %p1134_p8, %p1128_p4 }
  0x45   : > { %324 = vperm.xlu0 %1015, %v274_v13  }
  0x46   : > { %329 = vperm.xlu1 %1016, %v275_v14  }
  0x49   : > { %946 = vmatmul.mubr.msk.bf16.gmra.mxu0 %vm422_vm0, %v1024_v10  ;;  %314 = vperm.xlu0 %1015, %v272_v16  }
  0x4a   : > { %499 = vmatprep.mubr.bf16.mxu0 %v1706_v0  ;;  %319 = vperm.xlu1 %1016, %v273_v17  }
  0x4d   : > { %304 = vperm.xlu0 %1015, %v270_v18  }
  0x4e   : > { %309 = vperm.xlu1 %1016, %v271_v19  }
  0x51   : > { %947 = vmatmul.mubr.msk.bf16.gmra.mxu0 %vm422_vm0, %v1025_v15  ;;  %294 = vperm.xlu0 %1015, %v268_v21  }
  0x52   : > { %509 = vmatprep.mubr.bf16.mxu0 %v1706_v0  ;;  %299 = vperm.xlu1 %1016, %v269_v22  }
  0x55   : > { %284 = vperm.xlu0 %1015, %v266_v23  }
  0x56   : > { %289 = vperm.xlu1 %1016, %v267_v24  }
  0x59   : > { %948 = vmatmul.mubr.msk.bf16.gmra.mxu0 %vm422_vm0, %v1026_v20  ;;  %746 = vperm.xlu0 %1015, %v740_v26  }
  0x5a   : > { %519 = vmatprep.mubr.bf16.mxu0 %v1706_v0  ;;  %751 = vperm.xlu1 %1016, %v741_v27  }
  0x5d   : > { %756 = vperm.xlu0 %1015, %v742_v28  }
  0x5e   : > { %761 = vperm.xlu1 %1016, %v743_v29  }
  0x61   : > { %949 = vmatmul.mubr.msk.bf16.gmra.mxu0 %vm422_vm0, %v1027_v25 }
  0x62   : > { %529 = vmatprep.mubr.bf16.mxu0 %v1706_v0 }
  0x69   : > { %950 = vmatmul.mubr.msk.bf16.gmra.mxu0 %vm422_vm0, %v1028_v30 }
  0x6a   : > { %539 = vmatprep.mubr.bf16.mxu0 %v1706_v0 }
  0x71   : > { %951 = vmatmul.mubr.msk.bf16.gmra.mxu0 %vm422_vm0, %v1029_v31 }
  0x72   : > { %549 = vmatprep.mubr.bf16.mxu0 %v1706_v0 }
  0x79   : > { %952 = vmatmul.mubr.msk.bf16.gmra.mxu0 %vm422_vm0, %v1030_v32 }
  0xb4   : > { %v1439_v33 = vpop.permute.xlu0 %354 }
  0xb5   : > { %v1441_v34 = vpop.permute.xlu1 %344 }
  0xb8   : > { %v1443_v35 = vpop.permute.xlu0 %359 }
  0xb9   : > { %v1445_v36 = vpop.permute.xlu1 %349 }
  0xbc   : > { %v1447_v37 = vpop.permute.xlu0 %334 }
  0xbd   : > { %v1449_v38 = vpop.permute.xlu1 %339 }
  0xc0   : > { %v1451_v39 = vpop.permute.xlu0 %324 }
  0xc1   : > { %v1453_v40 = vpop.permute.xlu1 %329 }
  0xc4   : > { %v1455_v41 = vpop.permute.xlu0 %314 }
  0xc5   : > { %v1457_v42 = vpop.permute.xlu1 %319 }
  0xc8   : > { %v1459_v43 = vpop.permute.xlu0 %304 }
  0xc9   : > { %v1461_v44 = vpop.permute.xlu1 %309 }
  0xcc   : > { %v295_v45 = vpop.permute.xlu0 %294 }
  0xcd   : > { %v300_v46 = vpop.permute.xlu1 %299 }
  0xd0   : > { %v285_v47 = vpop.permute.xlu0 %284 }
  0xd1   : > { %v290_v51 = vpop.permute.xlu1 %289 }
 0x101   : > { %v481_v48 = vpop.f32.mrf.mxu0 }
 0x102   : > { %v482_v49 = vadd.f32 %v481_v48, %v285_v47 }
 0x103   : > { %v483_v50 = vpop.f32.mrf.mxu0 }
 0x104   : > { %v592_v52 = vmul.f32 0.70710677, %v482_v49  ;;  %v484_v53 = vadd.f32 %v483_v50, %v285_v47  ;;  %v560_v21 = vmul.f32 0.5, %v482_v49 }
 0x105   : > { %v485_v54 = vpop.f32.mrf.mxu0 }
 0x106   : > { %v593_v55 = vmul.f32 0.70710677, %v484_v53  ;;  %v486_v56 = vadd.f32 %v485_v54, %v290_v51  ;;  %1033 = verf.f32 %v592_v52  ;;  %v561_v28 = vmul.f32 0.5, %v484_v53 }
 0x107   : > { %v487_v57 = vpop.f32.mrf.mxu0 }
 0x108   : > { %v594_v58 = vmul.f32 0.70710677, %v486_v56  ;;  %v488_v59 = vadd.f32 %v487_v57, %v290_v51  ;;  %1035 = verf.f32 %v593_v55  ;;  %v562_v18 = vmul.f32 0.5, %v486_v56 }
 0x109   : > { %v491_v60 = vpop.f32.mrf.mxu0 }
 0x10a   : > { %1037 = verf.f32 %v594_v58  ;;  %v595_v61 = vmul.f32 0.70710677, %v488_v59  ;;  %v492_v62 = vadd.f32 %v491_v60, %v295_v45  ;;  %v563_v25 = vmul.f32 0.5, %v488_v59 }
 0x10b   : > { %v493_v63 = vpop.f32.mrf.mxu0 }
 0x10c   : > { %1039 = verf.f32 %v595_v61  ;;  %v596_v1 = vmul.f32 0.70710677, %v492_v62  ;;  %v494_v2 = vadd.f32 %v493_v63, %v295_v45  ;;  %v564_v56 = vmul.f32 0.5, %v492_v62 }
 0x10d   : > { %v495_v3 = vpop.f32.mrf.mxu0 }
 0x10e   : > { %v597_v4 = vmul.f32 0.70710677, %v494_v2  ;;  %v496_v5 = vadd.f32 %v495_v3, %v300_v46  ;;  %1041 = verf.f32 %v596_v1  ;;  %v565_v58 = vmul.f32 0.5, %v494_v2 }
 0x10f   : > { %v497_v6 = vpop.f32.mrf.mxu0 }
 0x110   : > { %1043 = verf.f32 %v597_v4  ;;  %v598_v7 = vmul.f32 0.70710677, %v496_v5  ;;  %v498_v8 = vadd.f32 %v497_v6, %v300_v46  ;;  %v566_v53 = vmul.f32 0.5, %v496_v5 }
 0x111   : > { %v1463_v9 = vpop.f32.mrf.mxu0 }
 0x112   : > { %1045 = verf.f32 %v598_v7  ;;  %v599_v10 = vmul.f32 0.70710677, %v498_v8  ;;  %v567_v60 = vmul.f32 0.5, %v498_v8 }
 0x113   : > { %v503_v11 = vpop.f32.mrf.mxu0  ;;  %v1034_v12 = vpop.eup %1033 }
 0x114   : > { %1047 = verf.f32 %v599_v10  ;;  %v656_v16 = vadd.f32 1.0, %v1034_v12 }
 0x115   : > { %v505_v13 = vpop.f32.mrf.mxu0  ;;  %v1036_v14 = vpop.eup %1035 }
 0x116   : > { %v657_v22 = vadd.f32 1.0, %v1036_v14  ;;  %v1471_v27 = vmul.f32 %v656_v16, %v560_v21  ;;  %v1502_v16 = vadd.f32 %v503_v11, %v1459_v43 }
 0x117   : > { %v1038_v15 = vpop.eup %1037  ;;  %v1465_v17 = vpop.f32.mrf.mxu0 }
 0x118   : > { %v658_v19 = vadd.f32 1.0, %v1038_v15  ;;  %v1477_v45 = vmul.f32 %v657_v22, %v561_v28 }
 0x119   : > { %v1040_v20 = vpop.eup %1039  ;;  %v1467_v23 = vpop.f32.mrf.mxu0 }
 0x11a   : > { %v1469_v24 = vmul.f32 %v658_v19, %v562_v18  ;;  %v659_v26 = vadd.f32 1.0, %v1040_v20  ;;  %v1505_v18 = vadd.f32 %v505_v13, %v1461_v44 }
 0x11b   : > { %v1473_v29 = vpop.f32.mrf.mxu0  ;;  %v1042_v30 = vpop.eup %1041 }
 0x11c   : > { %v1475_v31 = vmul.f32 %v659_v26, %v563_v25  ;;  %v660_v49 = vadd.f32 1.0, %v1042_v30  ;;  %v601_v25 = vmul.f32 0.70710677, %v1502_v16  ;;  %v602_v28 = vmul.f32 0.70710677, %v1505_v18 }
 0x11d   : > { %v1044_v32 = vpop.eup %1043  ;;  %v1479_v46 = vpop.f32.mrf.mxu0 }
 0x11e   : > { %v661_v52 = vadd.f32 1.0, %v1044_v32  ;;  %v1491_v63 = vmul.f32 %v660_v49, %v564_v56  ;;  %1049 = verf.f32 %v601_v25 }
 0x11f   : > { %v1046_v48 = vpop.eup %1045  ;;  %v1483_v50 = vpop.f32.mrf.mxu0  ;;  %1051 = verf.f32 %v602_v28 }
 0x120   : > { %v662_v54 = vadd.f32 1.0, %v1046_v48  ;;  %v1493_v3 = vmul.f32 %v661_v52, %v565_v58 }
 0x121   : > { %v1048_v55 = vpop.eup %1047  ;;  %v1487_v57 = vpop.f32.mrf.mxu0 }
 0x122   : > { %v1489_v59 = vmul.f32 %v662_v54, %v566_v53  ;;  %v663_v61 = vadd.f32 1.0, %v1048_v55 }
 0x123   : > { %v523_v1 = vpop.f32.mrf.mxu0 }
 0x124   : > { %v1495_v4 = vmul.f32 %v663_v61, %v567_v60  ;;  %v726_v5 = vpack.c.bf16 %v1489_v59, %v1491_v63  ;;  %v1032_v59 = vld [vmem:[%s1701_s3 + $0x8] sm:$0xff]   ;;  %v747_v63 = vpop.permute.xlu0 %746 }
 0x125   : > { %v525_v6 = vpop.f32.mrf.mxu0 }
 0x126   : > { %v727_v62 = vpack.c.bf16 %v1495_v4, %v1493_v3 }
 0x127   : > { %v527_v7 = vpop.f32.mrf.mxu0 }
 0x129   : > { %v531_v2 = vpop.f32.mrf.mxu0 }
 0x12b   : > { %v533_v10 = vpop.f32.mrf.mxu0 }
 0x12d   : > { %v535_v12 = vpop.f32.mrf.mxu0 }
 0x12f   : > { %v537_v8 = vpop.f32.mrf.mxu0 }
 0x130   : > { %v1508_v20 = vadd.f32 %v537_v8, %v1449_v38  ;;  %v1546_v8 = vadd.f32 %v527_v7, %v1453_v40  ;;  %v1559_v7 = vadd.f32 %v525_v6, %v1453_v40  ;;  %v1574_v40 = vadd.f32 %v1473_v29, %v1455_v41 }
 0x131   : > { %v541_v14 = vpop.f32.mrf.mxu0 }
 0x132   : > { %v615_v30 = vmul.f32 0.70710677, %v1508_v20  ;;  %v1531_v54 = vadd.f32 %v541_v14, %v1441_v34  ;;  %v610_v28 = vmul.f32 0.70710677, %v1559_v7  ;;  %v583_v47 = vmul.f32 0.5, %v1508_v20 }
 0x133   : > { %v543_v15 = vpop.f32.mrf.mxu0 }
 0x134   : > { %v1511_v21 = vadd.f32 %v543_v15, %v1441_v34  ;;  %1053 = verf.f32 %v615_v30  ;;  %v1593_v30 = vadd.f32 %v1467_v23, %v1455_v41 }
 0x135   : > { %v545_v19 = vpop.f32.mrf.mxu0 }
 0x136   : > { %v617_v13 = vmul.f32 0.70710677, %v1511_v21  ;;  %v1524_v49 = vadd.f32 %v545_v19, %v1445_v36  ;;  %v1551_v19 = vadd.f32 %v531_v2, %v1447_v37  ;;  %v604_v23 = vmul.f32 0.70710677, %v1593_v30 }
 0x137   : > { %v547_v22 = vpop.f32.mrf.mxu0 }
 0x138   : > { %v1515_v26 = vadd.f32 %v547_v22, %v1445_v36  ;;  %v1539_v36 = vadd.f32 %v533_v10, %v1447_v37  ;;  %1055 = verf.f32 %v617_v13  ;;  %v618_v34 = vmul.f32 0.70710677, %v1524_v49 }
 0x139   : > { %v551_v11 = vpop.f32.mrf.mxu0  ;;  %v616_v10 = vmul.f32 0.70710677, %v1531_v54  ;;  %v611_v37 = vmul.f32 0.70710677, %v1546_v8  ;;  %v612_v2 = vmul.f32 0.70710677, %v1551_v19 }
 0x13a   : > { %v1521_v32 = vadd.f32 %v551_v11, %v1439_v33  ;;  %v619_v52 = vmul.f32 0.70710677, %v1515_v26  ;;  %v1582_v11 = vpop.eup %1049  ;;  %v605_v13 = vmul.f32 0.70710677, %v1574_v40 }
 0x13b   : > { %v553_v48 = vpop.f32.mrf.mxu0  ;;  %v1589_v29 = vpop.eup %1051 }
 0x13c   : > { %v1528_v53 = vadd.f32 %v553_v48, %v1439_v33  ;;  %v620_v56 = vmul.f32 0.70710677, %v1521_v32  ;;  %v1542_v33 = vadd.f32 %v535_v12, %v1449_v38  ;;  %1057 = verf.f32 %v619_v52 }
 0x13d   : > { %v555_v55 = vpop.f32.mrf.mxu0  ;;  %v1555_v38 = vadd.f32 %v523_v1, %v1451_v39  ;;  %v613_v12 = vmul.f32 0.70710677, %v1539_v36  ;;  %v1569_v1 = vadd.f32 %v1487_v57, %v1451_v39  ;;  %v1586_v39 = vadd.f32 %v1465_v17, %v1461_v44 }
 0x13e   : > { %v621_v58 = vmul.f32 0.70710677, %v1528_v53  ;;  %v1536_v60 = vadd.f32 %v555_v55, %v1443_v35  ;;  %v614_v25 = vmul.f32 0.70710677, %v1542_v33  ;;  %v1599_v44 = vadd.f32 %v1463_v9, %v1459_v43 }
 0x13f   : > { %v557_v61 = vpop.f32.mrf.mxu0  ;;  %v609_v6 = vmul.f32 0.70710677, %v1555_v38  ;;  %v603_v55 = vmul.f32 0.70710677, %v1586_v39 }
 0x140   : > { %1059 = verf.f32 %v621_v58  ;;  %v622_v14 = vmul.f32 0.70710677, %v1536_v60  ;;  %v558_v15 = vadd.f32 %v557_v61, %v1443_v35  ;;  %v1564_v35 = vadd.f32 %v1483_v50, %v1457_v42 }
 0x141   : > { %1061 = verf.f32 %v620_v56  ;;  %v1579_v50 = vadd.f32 %v1479_v46, %v1457_v42  ;;  %v608_v42 = vmul.f32 0.70710677, %v1569_v1  ;;  %v1054_v46 = vpop.eup %1053  ;;  %v600_v61 = vmul.f32 0.70710677, %v1599_v44 }
 0x142   : > { %1063 = verf.f32 %v622_v14  ;;  %v623_v22 = vmul.f32 0.70710677, %v558_v15  ;;  %v607_v57 = vmul.f32 0.70710677, %v1564_v35 }
 0x143   : > { %1065 = verf.f32 %v618_v34  ;;  %v606_v17 = vmul.f32 0.70710677, %v1579_v50 }
 0x144   : > { %1067 = verf.f32 %v623_v22  ;;  %v590_v22 = vmul.f32 0.5, %v1536_v60 }
 0x145   : > { %1069 = verf.f32 %v616_v10  ;;  %v1056_v48 = vpop.eup %1055 }
 0x146   : > { %1071 = verf.f32 %v613_v12  ;;  %v587_v12 = vmul.f32 0.5, %v1515_v26 }
 0x147   : > { %1073 = verf.f32 %v614_v25 }
 0x148   : > { %1075 = verf.f32 %v611_v37 }
 0x149   : > { %1077 = verf.f32 %v612_v2  ;;  %v1058_v52 = vpop.eup %1057  ;;  %v681_v2 = vadd.f32 1.0, %v1056_v48  ;;  %v586_v48 = vmul.f32 0.5, %v1524_v49 }
 0x14a   : > { %1079 = verf.f32 %v609_v6  ;;  %v683_v43 = vadd.f32 1.0, %v1058_v52  ;;  %v589_v6 = vmul.f32 0.5, %v1528_v53  ;;  %v588_v52 = vmul.f32 0.5, %v1521_v32 }
 0x14b   : > { %1081 = verf.f32 %v610_v28  ;;  %v591_v28 = vmul.f32 0.5, %v558_v15 }
 0x14c   : > { %1083 = verf.f32 %v607_v57 }
 0x14d   : > { %v1060_v41 = vpop.eup %1059  ;;  %1085 = verf.f32 %v608_v42 }
 0x14e   : > { %v1062_v56 = vpop.eup %1061  ;;  %1087 = verf.f32 %v605_v13  ;;  %v685_v9 = vadd.f32 1.0, %v1060_v41  ;;  %v585_v13 = vmul.f32 0.5, %v1511_v21 }
 0x14f   : > { %v1064_v58 = vpop.eup %1063  ;;  %1089 = verf.f32 %v606_v17  ;;  %v684_v25 = vadd.f32 1.0, %v1062_v56 }
 0x150   : > { %v1066_v34 = vpop.eup %1065  ;;  %1091 = verf.f32 %v603_v55  ;;  %v686_v14 = vadd.f32 1.0, %v1064_v58  ;;  %v715_v58 = vmul.f32 %v683_v43, %v587_v12  ;;  %v717_v26 = vmul.f32 %v685_v9, %v589_v6 }
 0x151   : > { %v1068_v10 = vpop.eup %1067  ;;  %1093 = verf.f32 %v604_v23  ;;  %v682_v17 = vadd.f32 1.0, %v1066_v34  ;;  %v679_v23 = vadd.f32 1.0, %v1054_v46  ;;  %v716_v53 = vmul.f32 %v684_v25, %v588_v52 }
 0x152   : > { %v1070_v37 = vpop.eup %1069  ;;  %v687_v57 = vadd.f32 1.0, %v1068_v10  ;;  %v718_v55 = vmul.f32 %v686_v14, %v590_v22  ;;  %1095 = verf.f32 %v600_v61  ;;  %v713_v21 = vmul.f32 %v681_v2, %v585_v13 }
 0x153   : > { %v1072_v42 = vpop.eup %1071  ;;  %v680_v56 = vadd.f32 1.0, %v1070_v37  ;;  %v584_v14 = vmul.f32 0.5, %v1531_v54  ;;  %v714_v46 = vmul.f32 %v682_v17, %v586_v48  ;;  %v581_v61 = vmul.f32 0.5, %v1539_v36 }
 0x154   : > { %v1074_v41 = vpop.eup %1073  ;;  %v719_v0 = vmul.f32 %v687_v57, %v591_v28  ;;  %v677_v10 = vadd.f32 1.0, %v1072_v42  ;;  %v738_v43 = vpack.c.bf16 %v718_v55, %v716_v53  ;;  %v711_v22 = vmul.f32 %v679_v23, %v583_v47 }
 0x155   : > { %v1076_v60 = vpop.eup %1075  ;;  %v678_v32 = vadd.f32 1.0, %v1074_v41  ;;  %v737_v49 = vpack.c.bf16 %v715_v58, %v713_v21  ;;  %v582_v6 = vmul.f32 0.5, %v1542_v33  ;;  %v712_v20 = vmul.f32 %v680_v56, %v584_v14 }
 0x156   : > { %v1078_v15 = vpop.eup %1077  ;;  %v739_v34 = vpack.c.bf16 %v719_v0, %v717_v26  ;;  %v675_v12 = vadd.f32 1.0, %v1076_v60  ;;  %v579_v28 = vmul.f32 0.5, %v1546_v8  ;;  %v709_v54 = vmul.f32 %v677_v10, %v581_v61 }
 0x157   : > { %v1080_v51 = vpop.eup %1079  ;;  %v676_v37 = vadd.f32 1.0, %v1078_v15  ;;  %v580_v13 = vmul.f32 0.5, %v1551_v19  ;;  %v710_v36 = vmul.f32 %v678_v32, %v582_v6  ;;  %v736_v47 = vpack.c.bf16 %v714_v46, %v712_v20 }
 0x158   : > { %v1082_v9 = vpop.eup %1081  ;;  %776 = vmatprep.subr.bf16.mxu1 %v739_v34  ;;  %v673_v2 = vadd.f32 1.0, %v1080_v51  ;;  %v577_v55 = vmul.f32 0.5, %v1555_v38  ;;  %v707_v41 = vmul.f32 %v675_v12, %v579_v28  ;;  %v735_v33 = vpack.c.bf16 %v711_v22, %v709_v54 }
 0x159   : > { %v1084_v25 = vpop.eup %1083  ;;  %777 = vmatpush1.bf16.msra.mxu1 %v738_v43  ;;  %v674_v42 = vadd.f32 1.0, %v1082_v9  ;;  %v578_v51 = vmul.f32 0.5, %v1559_v7  ;;  %v708_v26 = vmul.f32 %v676_v37, %v580_v13  ;;  %v575_v56 = vmul.f32 0.5, %v1564_v35 }
 0x15a   : > { %v1086_v0 = vpop.eup %1085  ;;  %778 = vmatprep.subr.bf16.mxu1 %v737_v49  ;;  %v671_v52 = vadd.f32 1.0, %v1084_v25  ;;  %v705_v48 = vmul.f32 %v673_v2, %v577_v55  ;;  %v576_v53 = vmul.f32 0.5, %v1569_v1  ;;  %v573_v21 = vmul.f32 0.5, %v1574_v40 }
 0x15b   : > { %v1088_v57 = vpop.eup %1087  ;;  %v672_v58 = vadd.f32 1.0, %v1086_v0  ;;  %v706_v15 = vmul.f32 %v674_v42, %v578_v51  ;;  %v734_v10 = vpack.c.bf16 %v710_v36, %v708_v26  ;;  %v574_v7 = vmul.f32 0.5, %v1579_v50  ;;  %v757_v42 = vpop.permute.xlu0 %756 }
 0x15c   : > { %v1090_v17 = vpop.eup %1089  ;;  %v669_v60 = vadd.f32 1.0, %v1088_v57  ;;  %v703_v34 = vmul.f32 %v671_v52, %v575_v56  ;;  %v733_v32 = vpack.c.bf16 %v707_v41, %v705_v48  ;;  %v665_v35 = vadd.f32 1.0, %v1582_v11 }
 0x15d   : > { %v1092_v23 = vpop.eup %1091  ;;  %779 = vmatpush1.bf16.msra.mxu1 %v736_v47  ;;  %v670_v19 = vadd.f32 1.0, %v1090_v17  ;;  %v704_v46 = vmul.f32 %v672_v58, %v576_v53  ;;  %v571_v9 = vmul.f32 0.5, %v1586_v39  ;;  %v666_v1 = vadd.f32 1.0, %v1589_v29 }
 0x15e   : > { %v1094_v8 = vpop.eup %1093  ;;  %780 = vmatprep.subr.bf16.mxu1 %v735_v33  ;;  %v667_v38 = vadd.f32 1.0, %v1092_v23  ;;  %v701_v12 = vmul.f32 %v669_v60, %v573_v21  ;;  %v572_v61 = vmul.f32 0.5, %v1593_v30  ;;  %v569_v49 = vmul.f32 0.5, %v1502_v16 }
 0x15f   : > { %v668_v14 = vadd.f32 1.0, %v1094_v8  ;;  %v1096_v43 = vpop.eup %1095  ;;  %v702_v22 = vmul.f32 %v670_v19, %v574_v7  ;;  %v732_v40 = vpack.c.bf16 %v706_v15, %v704_v46  ;;  %v570_v6 = vmul.f32 0.5, %v1505_v18  ;;  %v1031_v18 = vld [vmem:[%s1701_s3] sm:$0xff]  }
 0x160   : > { %v699_v25 = vmul.f32 %v667_v38, %v571_v9  ;;  %v731_v37 = vpack.c.bf16 %v703_v34, %v701_v12  ;;  %v664_v50 = vadd.f32 1.0, %v1096_v43  ;;  %v697_v11 = vmul.f32 %v665_v35, %v569_v49 }
 0x161   : > { %781 = vmatpush1.bf16.msra.mxu1 %v734_v10  ;;  %v700_v20 = vmul.f32 %v668_v14, %v572_v61  ;;  %v568_v39 = vmul.f32 0.5, %v1599_v44  ;;  %v698_v0 = vmul.f32 %v666_v1, %v570_v6  ;;  %v1714_v16 = vpack.c.bf16 %v1475_v31, %v1477_v45 }
 0x162   : > { %782 = vmatprep.subr.bf16.mxu1 %v733_v32  ;;  %v729_v29 = vpack.c.bf16 %v699_v25, %v697_v11  ;;  %v1715_v44 = vpack.c.bf16 %v1469_v24, %v1471_v27  ;;  %v1716_v54 = vmov 0  }
 0x163   : > { %v730_v2 = vpack.c.bf16 %v702_v22, %v700_v20  ;;  %v696_v30 = vmul.f32 %v664_v50, %v568_v39 }
 0x165   : > { %783 = vmatpush1.bf16.msra.mxu1 %v732_v40  ;;  %v728_v28 = vpack.c.bf16 %v698_v0, %v696_v30 }
 0x166   : > { %784 = vmatprep.subr.bf16.mxu1 %v731_v37 }
 0x169   : > { %785 = vmatpush1.bf16.msra.mxu1 %v730_v2 }
 0x16a   : > { %786 = vmatprep.subr.bf16.mxu1 %v729_v29 }
 0x16d   : > { %787 = vmatpush1.bf16.msra.mxu1 %v728_v28 }
 0x16e   : > { %788 = vmatprep.subr.bf16.mxu1 %v727_v62 }
 0x171   : > { %789 = vmatpush1.bf16.msra.mxu1 %v726_v5  ;;  %v752_v5 = vpop.permute.xlu1 %751 }
 0x172   : > { %790 = vmatprep.subr.bf16.mxu1 %v1714_v16 }
 0x175   : > { %791 = vmatpush1.bf16.msra.mxu1 %v1715_v44  ;;  %v762_v52 = vpop.permute.xlu1 %761 }
 0x178   : > { %809 = vmatmul.mubr.bf16.vlgmr.msra.gmra.mxu1 %v1031_v18 }
 0x179   : > { %818 = vmatprep.mubr.bf16.mxu1 %v1716_v54 }
 0x180   : > { %819 = vmatmul.mubr.bf16.gmra.mxu1 %v1032_v59 }
 0x238   : > { %v810_v31 = vpop.f32.mrf.mxu1 }
 0x239   : > { %v811_v45 = vadd.f32 %v810_v31, %v747_v63 }
 0x23a   : > { %v812_v3 = vpop.f32.mrf.mxu1 }
 0x23b   : > { %829 = vst [vmem:[%s242_s14] sm:$0xff] %v811_v45  ;;  %v813_v4 = vadd.f32 %v812_v3, %v747_v63 }
 0x23c   : > { %v814_v24 = vpop.f32.mrf.mxu1 }
 0x23d   : > { %830 = vst [vmem:[%s242_s14 + $0x8] sm:$0xff] %v813_v4  ;;  %v815_v27 = vadd.f32 %v814_v24, %v752_v5 }
 0x23e   : > { %v816_v62 = vpop.f32.mrf.mxu1 }
 0x23f   : > { %831 = vst [vmem:[%s242_s14 + $0x10] sm:$0xff] %v815_v27  ;;  %v817_v57 = vadd.f32 %v816_v62, %v752_v5 }
 0x240   : > { %v820_v13 = vpop.f32.mrf.mxu1 }
 0x241   : > { %832 = vst [vmem:[%s242_s14 + $0x18] sm:$0xff] %v817_v57  ;;  %v821_v36 = vadd.f32 %v820_v13, %v757_v42 }
 0x242   : > { %v822_v47 = vpop.f32.mrf.mxu1 }
 0x243   : > { %833 = vst [vmem:[%s242_s14 + $0x20] sm:$0xff] %v821_v36  ;;  %v823_v17 = vadd.f32 %v822_v47, %v757_v42 }
 0x244   : > { %v824_v55 = vpop.f32.mrf.mxu1 }
 0x245   : > { %834 = vst [vmem:[%s242_s14 + $0x28] sm:$0xff] %v823_v17  ;;  %v825_v41 = vadd.f32 %v824_v55, %v762_v52 }
 0x246   : > { %v826_v33 = vpop.f32.mrf.mxu1 }
 0x247   : > { %835 = vst [vmem:[%s242_s14 + $0x30] sm:$0xff] %v825_v41  ;;  %v827_v23 = vadd.f32 %v826_v33, %v762_v52 }
 0x249   : > { %836 = vst [vmem:[%s242_s14 + $0x38] sm:$0xff] %v827_v23 }
 0x24a   : > { %1138 = shalt.err (!%p1135_p9)
}
 0x24b   : > { %s1139_s23 = scalar_lea.hbm %s1656_s9, 1024  ;;  %s1143_s8 = scalar_lea.hbm %s1703_s5, 8192 }
 0x24c   : > { %p1140_p0 = scmp.ne.s32.totalorder %s1656_s9, %s1139_s23  ;;  %p1144_p1 = scmp.lt.s32.totalorder %s1656_s9, %s1703_s5 }
 0x24d   : > { %p1145_p3 = scmp.lt.s32.totalorder %s1143_s8, %s1139_s23 }
 0x24e   : > { %p1141_p2 = pnand %p1140_p0, %p1717_p11 }
 0x24f   : > { %p1146_p6 = por %p1145_p3, %p1144_p1 }
 0x250   : > { %p1142_p13 = pneg %p1141_p2 }
 0x252   : > { %p1147_p10 = pnand %p1146_p6, %p1142_p13 }
 0x254   : > { %1150 = shalt.err (!%p1147_p10)
}
 0x255   : > { %s1197_s15 = smov 256   ;;  %s1198_s16 = smov 2048  }
 0x256   : > { %s1199_s7 = smov 16  }
 0x257   : > { %964 = dma.vmem_to_hbm [thread:$0]  (%p1717_p11), %s1651_s29, 1024, %s1656_s9, %s838_s10, %s1197_s15, %s1198_s16, %s1199_s7  }
 0x258 PF: > { %p975_p12 = scmp.ge.s32.totalorder %s1189_s21, 2  ;;  %s866_s22 = sand.u32 1, %s1177_s18  }
 0x259   : > { %p1718_p4 = scmp.ne.s32.totalorder %s1710_s6, 0  ;;  %s867_s11 = scalar_lea.sflag [#allocation4], %s866_s22 }
 0x25b   : > { %p971_p5 = pnand %p975_p12, %p1718_p4 }
 0x25d   : > { %p972_p7 = pneg %p971_p5 }
 0x25f   : > { %1172 = dma.done.wait (%p972_p7), %s867_s11, 1024  }
 0x260   : > { %1174 = vsyncadd (%p972_p7), %s867_s11, 4294966272  ;;  %p18_p8 = scmp.ge.s32.totalorder %s1255_s24, 10   ;;  %s1719_s18 = smov %s1181_s19 }
 0x261   : > { %s1720_s19 = smov %s1185_s20  ;;  %s1721_s20 = smov %s1267_s27 }
 0x262   : > { %s1722_s21 = smov %s1255_s24  ;;  %20 = sbr.rel (!%p18_p8) target bundleno = 5 (0x5), region = 85 }
 0x267   :  { %872 = vsyncpa [#allocation3], 1 }
 0x268   :  { %874 = vsyncpa [#allocation3 + $0x1], 1 }
 0x269   :  { %875 = vsyncpa [#allocation4], 1 }
 0x26a   :  { %877 = vsyncpa [#allocation4 + $0x1], 1 }

</bundles_post_ra>
